<compile_context>
chip_gen: v5e
topology: v5e:2x2
jax: 0.10.0
libtpu: 0.0.40
codegen_flags: <defaults>
</compile_context>

<pallas_src>
import functools

import jax
import jax.numpy as jnp
from jax import lax
from jax.experimental import pallas as pl
from jax.experimental.pallas import tpu as pltpu


def _round_up(x, m):
    return (x + m - 1) // m * m


def _gram_block(lhs_ref, rhs_ref):
    # (tm, tk) x (Mp, tk), contracting on axis 1 of both -> (tm, Mp).
    # No explicit transpose: MXU-friendly transposed-operand matmul.
    return lax.dot_general(
        lhs_ref[...], rhs_ref[...],
        dimension_numbers=(((1,), (1,)), ((), ())),
        preferred_element_type=jnp.float32)


def _gram_kernel(fl_ref, fr_ref, g_ref, acc_ref, *, inv_norm):
    """Gram-only path (used to build the target): accumulate over K."""
    k = pl.program_id(1)

    @pl.when(k == 0)
    def _():
        acc_ref[...] = jnp.zeros_like(acc_ref)

    acc_ref[...] += _gram_block(fl_ref, fr_ref)

    @pl.when(k == pl.num_programs(1) - 1)
    def _():
        g_ref[...] = (acc_ref[...] * inv_norm).astype(g_ref.dtype)


def _gram_mse_kernel(fl_ref, fr_ref, tgt_ref, g_ref, lp_ref, acc_ref, *,
                     inv_norm, inv_mse):
    """Gram + MSE-vs-target path: accumulate over K, reduce in the epilogue."""
    k = pl.program_id(1)

    @pl.when(k == 0)
    def _():
        acc_ref[...] = jnp.zeros_like(acc_ref)

    acc_ref[...] += _gram_block(fl_ref, fr_ref)

    @pl.when(k == pl.num_programs(1) - 1)
    def _():
        g = acc_ref[...] * inv_norm
        g_ref[...] = g.astype(g_ref.dtype)
        diff = g - tgt_ref[...].astype(jnp.float32)
        part = jnp.sum(diff * diff) * inv_mse
        # Store this row block's partial at [0, 0] of its lane-dense (8,128)
        # slot; the rest is zero so a host-side sum recovers the loss.
        row = lax.broadcasted_iota(jnp.int32, lp_ref.shape, 0)
        col = lax.broadcasted_iota(jnp.int32, lp_ref.shape, 1)
        lp_ref[...] = jnp.where((row == 0) & (col == 0), part, 0.0)


def _gram_pallas(f, target, *, inv_norm, inv_mse, tm, tk):
    """f: (Mp, Kp) padded features. target: padded (Mp, Mp) gram or None."""
    Mp, Kp = f.shape
    grid_m = Mp // tm
    grid_k = Kp // tk
    grid = (grid_m, grid_k)

    lhs_spec = pl.BlockSpec((tm, tk), lambda i, k: (i, k))   # row block of F
    rhs_spec = pl.BlockSpec((Mp, tk), lambda i, k: (0, k))   # all rows of F
    g_spec = pl.BlockSpec((tm, Mp), lambda i, k: (i, 0))     # gram row block
    scratch = [pltpu.VMEM((tm, Mp), jnp.float32)]            # f32 accumulator
    cp = pltpu.CompilerParams(
        dimension_semantics=("parallel", "arbitrary"),
        vmem_limit_bytes=48 * 1024 * 1024,
    )

    if target is None:
        g = pl.pallas_call(
            functools.partial(_gram_kernel, inv_norm=inv_norm),
            out_shape=jax.ShapeDtypeStruct((Mp, Mp), jnp.float32),
            grid_spec=pltpu.PrefetchScalarGridSpec(
                num_scalar_prefetch=0,
                grid=grid,
                in_specs=[lhs_spec, rhs_spec],
                out_specs=g_spec,
                scratch_shapes=scratch),
            compiler_params=cp,
        )(f, f)
        return g, None

    tgt_spec = pl.BlockSpec((tm, Mp), lambda i, k: (i, 0))
    lp_spec = pl.BlockSpec((8, 128), lambda i, k: (i, 0))
    g, lp = pl.pallas_call(
        functools.partial(_gram_mse_kernel, inv_norm=inv_norm, inv_mse=inv_mse),
        out_shape=(
            jax.ShapeDtypeStruct((Mp, Mp), jnp.float32),
            jax.ShapeDtypeStruct((grid_m * 8, 128), jnp.float32),
        ),
        grid_spec=pltpu.PrefetchScalarGridSpec(
            num_scalar_prefetch=0,
            grid=grid,
            in_specs=[lhs_spec, rhs_spec, tgt_spec],
            out_specs=[g_spec, lp_spec],
            scratch_shapes=scratch),
        compiler_params=cp,
    )(f, f, target)
    return g, jnp.sum(lp)


def _prep_features(x, tk):
    """NCHW -> zero-padded (Mp, Kp) features in the input's native dtype."""
    a, b, c, d = x.shape
    M, K = a * b, c * d
    f = x.reshape(M, K)                       # no dtype up-cast (bf16 stays bf16)
    tk_eff = min(tk, _round_up(K, 128))
    Mp = _round_up(M, 128)
    Kp = _round_up(K, tk_eff)
    if (Mp, Kp) != (M, K):
        f = jnp.pad(f, ((0, Mp - M), (0, Kp - K)))
    return f, M, tk_eff


def _pick_tm(Mp):
    return 256 if Mp % 256 == 0 else 128


def gram_matrix(x, *, tk=512):
    """Pallas gram matrix of an NCHW tensor, matching torch gram_matrix."""
    a, b, c, d = x.shape
    f, M, tk_eff = _prep_features(x, tk)
    g_pad, _ = _gram_pallas(
        f, None,
        inv_norm=1.0 / float(a * b * c * d), inv_mse=0.0,
        tm=_pick_tm(f.shape[0]), tk=tk_eff)
    return g_pad[:M, :M]


class StyleLoss:
    """JAX/Pallas equivalent of the PyTorch StyleLoss module."""

    def __init__(self, target_feature, *, tk=512):
        self.tk = tk
        a, b, c, d = target_feature.shape
        f, M, tk_eff = _prep_features(target_feature, tk)
        g_pad, _ = _gram_pallas(
            f, None,
            inv_norm=1.0 / float(a * b * c * d), inv_mse=0.0,
            tm=_pick_tm(f.shape[0]), tk=tk_eff)
        self._m = M
        self._target_padded = g_pad            # (Mp, Mp); zero outside [:M,:M]
        self.target = g_pad[:M, :M]            # same values as torch .target

    def __call__(self, x):
        a, b, c, d = x.shape
        f, M, tk_eff = _prep_features(x, self.tk)
        assert M == self._m, "gram size mismatch vs. target"
        _, loss = _gram_pallas(
            f, self._target_padded,
            inv_norm=1.0 / float(a * b * c * d),
            inv_mse=1.0 / float(M * M),
            tm=_pick_tm(f.shape[0]), tk=tk_eff)
        self.loss = loss
        return x                               # torch forward returns the input


if __name__ == "__main__":
    key = jax.random.PRNGKey(0)
    k_tgt, k_in = jax.random.split(key)

    # NCHW: batch=2, channels=4, spatial=16x16  ->  features (8, 256)
    shape = (2, 4, 16, 16)
    target_feature = jax.random.normal(k_tgt, shape, dtype=jnp.float32)
    x = jax.random.normal(k_in, shape, dtype=jnp.float32)

    module = StyleLoss(target_feature)
    out = module(x)
    jax.block_until_ready(out)
    jax.block_until_ready(module.loss)
    jax.block_until_ready(module.target)

    # Pure-JAX reference check.
    def ref_gram(t):
        a, b, c, d = t.shape
        feats = t.reshape(a * b, c * d)
        return (feats @ feats.T) / (a * b * c * d)

    g_ref_tgt = ref_gram(target_feature)
    g_ref_in = ref_gram(x)
    loss_ref = jnp.mean((g_ref_in - g_ref_tgt) ** 2)

    assert jnp.allclose(module.target, g_ref_tgt, rtol=1e-5, atol=1e-5)
    assert jnp.allclose(gram_matrix(x), g_ref_in, rtol=1e-5, atol=1e-5)
    assert jnp.allclose(module.loss, loss_ref, rtol=1e-5, atol=1e-5)
    assert jnp.allclose(out, x)

    print("KERNEL_OK")
</pallas_src>

<mosaic_0001>
module attributes {stable_mosaic.version = 11 : i64} {
  func.func @_gram_kernel(%arg0: i32, %arg1: i32, %arg2: memref<128x256xf32, #tpu.memory_space<vmem>>, %arg3: memref<128x256xf32, #tpu.memory_space<vmem>>, %arg4: memref<128x128xf32, #tpu.memory_space<vmem>>, %arg5: memref<128x128xf32, #tpu.memory_space<vmem>>) attributes {dimension_semantics = [#tpu.dimension_semantics<parallel>, #tpu.dimension_semantics<arbitrary>], iteration_bounds = array<i64: 1, 1>, scalar_prefetch = 0 : i64, scratch_operands = 1 : i64, tpu.core_type = #tpu.core_type<tc>, window_params = [{transform_indices = @transform_0, window_bounds = array<i64: 128, 256>}, {transform_indices = @transform_1, window_bounds = array<i64: 128, 256>}, {transform_indices = @transform_2, window_bounds = array<i64: 128, 128>}]} {
    %c0_i32 = arith.constant 0 : i32
    %0 = arith.cmpi eq, %arg1, %c0_i32 : i32
    %1 = arith.extui %0 : i1 to i32
    %c0_i32_0 = arith.constant 0 : i32
    %2 = arith.cmpi ne, %1, %c0_i32_0 : i32
    scf.if %2 {
      %cst_10 = arith.constant 0.000000e+00 : f32
      %12 = vector.broadcast %cst_10 : f32 to vector<128x128xf32>
      %c0_11 = arith.constant 0 : index
      %c0_12 = arith.constant 0 : index
      %13 = vector.load %arg5[%c0_11, %c0_12] : memref<128x128xf32, #tpu.memory_space<vmem>>, vector<128x128xf32>
      tpu.vector_store %arg5[%c0_11, %c0_12], %12 {strides = array<i32>} : memref<128x128xf32, #tpu.memory_space<vmem>>, vector<128x128xf32>,
    } else {
    }
    %c0 = arith.constant 0 : index
    %c0_1 = arith.constant 0 : index
    %3 = vector.load %arg5[%c0, %c0_1] : memref<128x128xf32, #tpu.memory_space<vmem>>, vector<128x128xf32>
    %c0_2 = arith.constant 0 : index
    %c0_3 = arith.constant 0 : index
    %4 = vector.load %arg2[%c0_2, %c0_3] : memref<128x256xf32, #tpu.memory_space<vmem>>, vector<128x256xf32>
    %c0_4 = arith.constant 0 : index
    %c0_5 = arith.constant 0 : index
    %5 = vector.load %arg3[%c0_4, %c0_5] : memref<128x256xf32, #tpu.memory_space<vmem>>, vector<128x256xf32>
    %cst = arith.constant dense<0.000000e+00> : vector<128x128xf32>
    %6 = tpu.matmul %4, %5, %cst {dimension_numbers = #tpu.dot_dimension_numbers<[1], [1], [0], [0], [0, 0, 1, 0], [], []>} : vector<128x256xf32>, vector<128x256xf32>, vector<128x128xf32> -> vector<128x128xf32>
    %7 = arith.addf %3, %6 : vector<128x128xf32>
    %c0_6 = arith.constant 0 : index
    %c0_7 = arith.constant 0 : index
    %8 = vector.load %arg5[%c0_6, %c0_7] : memref<128x128xf32, #tpu.memory_space<vmem>>, vector<128x128xf32>
    tpu.vector_store %arg5[%c0_6, %c0_7], %7 {strides = array<i32>} : memref<128x128xf32, #tpu.memory_space<vmem>>, vector<128x128xf32>,
    %c0_i32_8 = arith.constant 0 : i32
    %9 = arith.cmpi eq, %arg1, %c0_i32_8 : i32
    %10 = arith.extui %9 : i1 to i32
    %c0_i32_9 = arith.constant 0 : i32
    %11 = arith.cmpi ne, %10, %c0_i32_9 : i32
    scf.if %11 {
      %c0_10 = arith.constant 0 : index
      %c0_11 = arith.constant 0 : index
      %12 = vector.load %arg5[%c0_10, %c0_11] : memref<128x128xf32, #tpu.memory_space<vmem>>, vector<128x128xf32>
      %cst_12 = arith.constant 4.8828125E-4 : f32
      %13 = vector.broadcast %cst_12 : f32 to vector<128x128xf32>
      %14 = arith.mulf %12, %13 : vector<128x128xf32>
      %c0_13 = arith.constant 0 : index
      %c0_14 = arith.constant 0 : index
      %15 = vector.load %arg4[%c0_13, %c0_14] : memref<128x128xf32, #tpu.memory_space<vmem>>, vector<128x128xf32>
      tpu.vector_store %arg4[%c0_13, %c0_14], %14 {strides = array<i32>} : memref<128x128xf32, #tpu.memory_space<vmem>>, vector<128x128xf32>,
    } else {
    }
    return
  }
  func.func @transform_0(%arg0: i32, %arg1: i32) -> (i32, i32) {
    %c0_i32 = arith.constant 0 : i32
    return %arg0, %arg1 : i32, i32
  }
  func.func @transform_1(%arg0: i32, %arg1: i32) -> (i32, i32) {
    %c0_i32 = arith.constant 0 : i32
    %c0_i32_0 = arith.constant 0 : i32
    return %c0_i32, %arg1 : i32, i32
  }
  func.func @transform_2(%arg0: i32, %arg1: i32) -> (i32, i32) {
    %c0_i32 = arith.constant 0 : i32
    %c0_i32_0 = arith.constant 0 : i32
    return %arg0, %c0_i32 : i32, i32
  }
}

</mosaic_0001>

<bundles_post_ra>
// kernel: tpu_custom_call.1
= control target key start
LH: loop header
LB: loop body
LE: loop exit
PB: predicated region body
PF: predicated region fallthrough
CT: control target
= control target key end

     0   :  { %7 = vsyncpa [#allocation4], 0  ;;  %s525_s0 = inlined_call_operand.hbm [shape: f32[128,256], index: 0, kind: input, shape index: {}]   ;;  %s526_s1 = inlined_call_operand.hbm [shape: f32[128,256], index: 1, kind: input, shape index: {}]   ;;  %s527_s2 = inlined_call_operand.hbm [shape: f32[128,128], index: 2, kind: output, shape index: {}]  }
   0x1   :  { %8 = vsyncpa [#allocation7], 0 }
   0x2   :  { %9 = vsyncpa [#allocation5], 0  ;;  %s14_s11 = sshll.u32 %s525_s0, 4  ;;  %s494_s12 = smov [#allocation3]   ;;  %s15_s11 = int_to_ptr.hbm [resolvable:$true] %s14_s11 }
   0x3   :  { %s16_s13 = sshll.u32 %s494_s12, 4  ;;  %s27_s16 = sshll.u32 %s526_s1, 4  ;;  %s17_s13 = int_to_ptr.vmem [resolvable:$true] %s16_s13  ;;  %s28_s16 = int_to_ptr.hbm [resolvable:$true] %s27_s16 }
   0x4   :  { %s495_s17 = smov 256   ;;  %s496_s18 = smov 16  }
   0x5   :  { %22 = dma.hbm_to_vmem [thread:$0]  %s15_s11, 4096, %s17_s13, [#allocation4], %s495_s17, %s495_s17, %s496_s18  }
   0x6   :  { %s497_s19 = smov [#allocation6]  }
   0x7   :  { %s29_s20 = sshll.u32 %s497_s19, 4  ;;  %s30_s20 = int_to_ptr.vmem [resolvable:$true] %s29_s20 }
   0x8   :  { %35 = dma.hbm_to_vmem [thread:$0]  %s28_s16, 4096, %s30_s20, [#allocation7], %s495_s17, %s495_s17, %s496_s18  }
   0x9   :  { %488 = dma.done.wait [#allocation4], 4096  }
   0xa   :  { %489 = vsyncadd [#allocation4], 4294963200 }
   0xb   :  { %490 = dma.done.wait [#allocation7], 4096  }
   0xc   :  { %491 = vsyncadd [#allocation7], 4294963200  ;;  %v142_v0 = vld [vmem:[#allocation6 + $0xf0] sm:$0xff]  ;;  %v143_v1 = vld [vmem:[#allocation6 + $0xf8] sm:$0xff]  ;;  %s498_s0 = smov [#allocation8]   ;;  %s363_s23 = sshll.u32 %s527_s2, 4  ;;  %s364_s23 = int_to_ptr.hbm [resolvable:$true] %s363_s23 }
   0xd   :  { %377 = vmatpush.xpose.msra.mxu2 %v142_v0  ;;  %393 = vmatpush.xpose.msra.mxu3 %v143_v1  ;;  %v140_v2 = vld [vmem:[#allocation6 + $0xe0] sm:$0xff]  ;;  %v141_v3 = vld [vmem:[#allocation6 + $0xe8] sm:$0xff]  ;;  %v138_v4 = vld [vmem:[#allocation6 + $0xd0] sm:$0xff]  ;;  %s361_s1 = sshll.u32 %s498_s0, 4  ;;  %s499_s24 = smov 128   ;;  %s362_s1 = int_to_ptr.vmem [resolvable:$true] %s361_s1 }
   0xe   :  { %144 = vmatpush.xpose.msra.mxu0 %v142_v0  ;;  %209 = vmatpush.xpose.msra.mxu1 %v143_v1  ;;  %v139_v5 = vld [vmem:[#allocation6 + $0xd8] sm:$0xff]  ;;  %v136_v6 = vld [vmem:[#allocation6 + $0xc0] sm:$0xff]  ;;  %v137_v7 = vld [vmem:[#allocation6 + $0xc8] sm:$0xff]  ;;  %s500_s25 = smov 8  }
   0xf   :  { %v134_v8 = vld [vmem:[#allocation6 + $0xb0] sm:$0xff]  ;;  %v135_v9 = vld [vmem:[#allocation6 + $0xb8] sm:$0xff]  ;;  %v132_v10 = vld [vmem:[#allocation6 + $0xa0] sm:$0xff] }
  0x10   :  { %v133_v11 = vld [vmem:[#allocation6 + $0xa8] sm:$0xff]  ;;  %v130_v12 = vld [vmem:[#allocation6 + $0x90] sm:$0xff]  ;;  %v131_v13 = vld [vmem:[#allocation6 + $0x98] sm:$0xff] }
  0x11   :  { %378 = vmatpush.xpose.msra.mxu2 %v140_v2  ;;  %394 = vmatpush.xpose.msra.mxu3 %v141_v3  ;;  %v128_v14 = vld [vmem:[#allocation6 + $0x80] sm:$0xff]  ;;  %v129_v15 = vld [vmem:[#allocation6 + $0x88] sm:$0xff]  ;;  %v126_v16 = vld [vmem:[#allocation6 + $0x70] sm:$0xff] }
  0x12   :  { %145 = vmatpush.xpose.msra.mxu0 %v140_v2  ;;  %210 = vmatpush.xpose.msra.mxu1 %v141_v3  ;;  %v127_v17 = vld [vmem:[#allocation6 + $0x78] sm:$0xff]  ;;  %v124_v18 = vld [vmem:[#allocation6 + $0x60] sm:$0xff]  ;;  %v125_v19 = vld [vmem:[#allocation6 + $0x68] sm:$0xff] }
  0x13   :  { %v122_v20 = vld [vmem:[#allocation6 + $0x50] sm:$0xff]  ;;  %v123_v21 = vld [vmem:[#allocation6 + $0x58] sm:$0xff]  ;;  %v120_v22 = vld [vmem:[#allocation6 + $0x40] sm:$0xff] }
  0x14   :  { %v121_v23 = vld [vmem:[#allocation6 + $0x48] sm:$0xff]  ;;  %v118_v24 = vld [vmem:[#allocation6 + $0x30] sm:$0xff]  ;;  %v119_v25 = vld [vmem:[#allocation6 + $0x38] sm:$0xff] }
  0x15   :  { %379 = vmatpush.xpose.msra.mxu2 %v138_v4  ;;  %395 = vmatpush.xpose.msra.mxu3 %v139_v5  ;;  %v116_v26 = vld [vmem:[#allocation6 + $0x20] sm:$0xff]  ;;  %v117_v27 = vld [vmem:[#allocation6 + $0x28] sm:$0xff]  ;;  %v114_v28 = vld [vmem:[#allocation6 + $0x10] sm:$0xff] }
  0x16   :  { %146 = vmatpush.xpose.msra.mxu0 %v138_v4  ;;  %211 = vmatpush.xpose.msra.mxu1 %v139_v5  ;;  %v115_v29 = vld [vmem:[#allocation6 + $0x18] sm:$0xff]  ;;  %v112_v30 = vld [vmem:[#allocation6] sm:$0xff]  ;;  %v113_v31 = vld [vmem:[#allocation6 + $0x8] sm:$0xff] }
  0x17   :  { %v96_v32 = vld [vmem:[#allocation3 + $0x80] sm:$0xff]  ;;  %v97_v33 = vld [vmem:[#allocation3 + $0x88] sm:$0xff]  ;;  %v98_v36 = vld [vmem:[#allocation3 + $0x90] sm:$0xff] }
  0x18   :  { %v80_v34 = vld [vmem:[#allocation3] sm:$0xff]  ;;  %v81_v35 = vld [vmem:[#allocation3 + $0x8] sm:$0xff]  ;;  %v99_v37 = vld [vmem:[#allocation3 + $0x98] sm:$0xff] }
  0x19   :  { %380 = vmatpush.xpose.msra.mxu2 %v136_v6  ;;  %396 = vmatpush.xpose.msra.mxu3 %v137_v7  ;;  %v82_v38 = vld [vmem:[#allocation3 + $0x10] sm:$0xff]  ;;  %v83_v39 = vld [vmem:[#allocation3 + $0x18] sm:$0xff]  ;;  %v100_v40 = vld [vmem:[#allocation3 + $0xa0] sm:$0xff] }
  0x1a   :  { %147 = vmatpush.xpose.msra.mxu0 %v136_v6  ;;  %212 = vmatpush.xpose.msra.mxu1 %v137_v7  ;;  %v101_v41 = vld [vmem:[#allocation3 + $0xa8] sm:$0xff]  ;;  %v84_v42 = vld [vmem:[#allocation3 + $0x20] sm:$0xff]  ;;  %v102_v44 = vld [vmem:[#allocation3 + $0xb0] sm:$0xff] }
  0x1b   :  { %v85_v43 = vld [vmem:[#allocation3 + $0x28] sm:$0xff]  ;;  %v103_v45 = vld [vmem:[#allocation3 + $0xb8] sm:$0xff]  ;;  %v86_v46 = vld [vmem:[#allocation3 + $0x30] sm:$0xff] }
  0x1c   :  { %v87_v47 = vld [vmem:[#allocation3 + $0x38] sm:$0xff]  ;;  %v104_v48 = vld [vmem:[#allocation3 + $0xc0] sm:$0xff]  ;;  %v105_v49 = vld [vmem:[#allocation3 + $0xc8] sm:$0xff] }
  0x1d   :  { %381 = vmatpush.xpose.msra.mxu2 %v134_v8  ;;  %397 = vmatpush.xpose.msra.mxu3 %v135_v9  ;;  %v88_v50 = vld [vmem:[#allocation3 + $0x40] sm:$0xff]  ;;  %v89_v51 = vld [vmem:[#allocation3 + $0x48] sm:$0xff]  ;;  %v106_v52 = vld [vmem:[#allocation3 + $0xd0] sm:$0xff] }
  0x1e   :  { %148 = vmatpush.xpose.msra.mxu0 %v134_v8  ;;  %213 = vmatpush.xpose.msra.mxu1 %v135_v9  ;;  %v107_v53 = vld [vmem:[#allocation3 + $0xd8] sm:$0xff]  ;;  %v90_v54 = vld [vmem:[#allocation3 + $0x50] sm:$0xff]  ;;  %v108_v56 = vld [vmem:[#allocation3 + $0xe0] sm:$0xff] }
  0x1f   :  { %v91_v55 = vld [vmem:[#allocation3 + $0x58] sm:$0xff]  ;;  %v109_v57 = vld [vmem:[#allocation3 + $0xe8] sm:$0xff]  ;;  %v92_v58 = vld [vmem:[#allocation3 + $0x60] sm:$0xff] }
  0x20   :  { %v93_v59 = vld [vmem:[#allocation3 + $0x68] sm:$0xff]  ;;  %v110_v60 = vld [vmem:[#allocation3 + $0xf0] sm:$0xff]  ;;  %v111_v61 = vld [vmem:[#allocation3 + $0xf8] sm:$0xff] }
  0x21   :  { %382 = vmatpush.xpose.msra.mxu2 %v132_v10  ;;  %398 = vmatpush.xpose.msra.mxu3 %v133_v11  ;;  %v94_v62 = vld [vmem:[#allocation3 + $0x70] sm:$0xff]  ;;  %v95_v63 = vld [vmem:[#allocation3 + $0x78] sm:$0xff] }
  0x22   :  { %149 = vmatpush.xpose.msra.mxu0 %v132_v10  ;;  %214 = vmatpush.xpose.msra.mxu1 %v133_v11 }
  0x25   :  { %383 = vmatpush.xpose.msra.mxu2 %v130_v12  ;;  %399 = vmatpush.xpose.msra.mxu3 %v131_v13 }
  0x26   :  { %150 = vmatpush.xpose.msra.mxu0 %v130_v12  ;;  %215 = vmatpush.xpose.msra.mxu1 %v131_v13 }
  0x29   :  { %384 = vmatpush.xpose.msra.mxu2 %v128_v14  ;;  %400 = vmatpush.xpose.msra.mxu3 %v129_v15 }
  0x2a   :  { %151 = vmatpush.xpose.msra.mxu0 %v128_v14  ;;  %216 = vmatpush.xpose.msra.mxu1 %v129_v15 }
  0x2d   :  { %385 = vmatpush.xpose.msra.mxu2 %v126_v16  ;;  %401 = vmatpush.xpose.msra.mxu3 %v127_v17 }
  0x2e   :  { %152 = vmatpush.xpose.msra.mxu0 %v126_v16  ;;  %217 = vmatpush.xpose.msra.mxu1 %v127_v17 }
  0x31   :  { %386 = vmatpush.xpose.msra.mxu2 %v124_v18  ;;  %402 = vmatpush.xpose.msra.mxu3 %v125_v19 }
  0x32   :  { %153 = vmatpush.xpose.msra.mxu0 %v124_v18  ;;  %218 = vmatpush.xpose.msra.mxu1 %v125_v19 }
  0x35   :  { %387 = vmatpush.xpose.msra.mxu2 %v122_v20  ;;  %403 = vmatpush.xpose.msra.mxu3 %v123_v21 }
  0x36   :  { %154 = vmatpush.xpose.msra.mxu0 %v122_v20  ;;  %219 = vmatpush.xpose.msra.mxu1 %v123_v21 }
  0x39   :  { %388 = vmatpush.xpose.msra.mxu2 %v120_v22  ;;  %404 = vmatpush.xpose.msra.mxu3 %v121_v23 }
  0x3a   :  { %155 = vmatpush.xpose.msra.mxu0 %v120_v22  ;;  %220 = vmatpush.xpose.msra.mxu1 %v121_v23 }
  0x3d   :  { %389 = vmatpush.xpose.msra.mxu2 %v118_v24  ;;  %405 = vmatpush.xpose.msra.mxu3 %v119_v25 }
  0x3e   :  { %156 = vmatpush.xpose.msra.mxu0 %v118_v24  ;;  %221 = vmatpush.xpose.msra.mxu1 %v119_v25 }
  0x41   :  { %390 = vmatpush.xpose.msra.mxu2 %v116_v26  ;;  %406 = vmatpush.xpose.msra.mxu3 %v117_v27 }
  0x42   :  { %157 = vmatpush.xpose.msra.mxu0 %v116_v26  ;;  %222 = vmatpush.xpose.msra.mxu1 %v117_v27 }
  0x45   :  { %391 = vmatpush.xpose.msra.mxu2 %v114_v28  ;;  %407 = vmatpush.xpose.msra.mxu3 %v115_v29 }
  0x46   :  { %158 = vmatpush.xpose.msra.mxu0 %v114_v28  ;;  %223 = vmatpush.xpose.msra.mxu1 %v115_v29 }
  0x49   :  { %392 = vmatpush.xpose.msra.mxu2 %v112_v30  ;;  %408 = vmatpush.xpose.msra.mxu3 %v113_v31 }
  0x4a   :  { %159 = vmatpush.xpose.msra.mxu0 %v112_v30  ;;  %224 = vmatpush.xpose.msra.mxu1 %v113_v31 }
  0x4c   :  { %184 = vmatmul.f32.vlgmr.msra.gmra.mxu2 %v96_v32  ;;  %249 = vmatmul.f32.vlgmr.msra.gmra.mxu3 %v97_v33 }
  0x4d   :  { %160 = vmatmul.f32.vlgmr.msra.gmra.mxu0 %v80_v34  ;;  %225 = vmatmul.f32.vlgmr.msra.gmra.mxu1 %v81_v35 }
  0x54   :  { %187 = vmatmul.f32.gmra.mxu2 %v98_v36  ;;  %252 = vmatmul.f32.gmra.mxu3 %v99_v37 }
  0x55   :  { %163 = vmatmul.f32.gmra.mxu0 %v82_v38  ;;  %228 = vmatmul.f32.gmra.mxu1 %v83_v39 }
  0x5c   :  { %190 = vmatmul.f32.gmra.mxu2 %v100_v40  ;;  %255 = vmatmul.f32.gmra.mxu3 %v101_v41 }
  0x5d   :  { %166 = vmatmul.f32.gmra.mxu0 %v84_v42  ;;  %231 = vmatmul.f32.gmra.mxu1 %v85_v43 }
  0x64   :  { %193 = vmatmul.f32.gmra.mxu2 %v102_v44  ;;  %258 = vmatmul.f32.gmra.mxu3 %v103_v45 }
  0x65   :  { %169 = vmatmul.f32.gmra.mxu0 %v86_v46  ;;  %234 = vmatmul.f32.gmra.mxu1 %v87_v47 }
  0x6c   :  { %196 = vmatmul.f32.gmra.mxu2 %v104_v48  ;;  %261 = vmatmul.f32.gmra.mxu3 %v105_v49 }
  0x6d   :  { %172 = vmatmul.f32.gmra.mxu0 %v88_v50  ;;  %237 = vmatmul.f32.gmra.mxu1 %v89_v51 }
  0x74   :  { %199 = vmatmul.f32.gmra.mxu2 %v106_v52  ;;  %264 = vmatmul.f32.gmra.mxu3 %v107_v53 }
  0x75   :  { %175 = vmatmul.f32.gmra.mxu0 %v90_v54  ;;  %240 = vmatmul.f32.gmra.mxu1 %v91_v55 }
  0x7c   :  { %202 = vmatmul.f32.gmra.mxu2 %v108_v56  ;;  %267 = vmatmul.f32.gmra.mxu3 %v109_v57 }
  0x7d   :  { %178 = vmatmul.f32.gmra.mxu0 %v92_v58  ;;  %243 = vmatmul.f32.gmra.mxu1 %v93_v59 }
  0x84   :  { %205 = vmatmul.f32.gmra.mxu2 %v110_v60  ;;  %270 = vmatmul.f32.gmra.mxu3 %v111_v61 }
  0x85   :  { %181 = vmatmul.f32.gmra.mxu0 %v94_v62  ;;  %246 = vmatmul.f32.gmra.mxu1 %v95_v63 }
  0xca   :  { %v161_v0 = vpop.f32.mrf.mxu0  ;;  %v226_v1 = vpop.f32.mrf.mxu1 }
  0xcb   :  { %v227_v2 = vadd.f32 %v226_v1, %v161_v0 }
  0xcd   :  { %v325_v3 = vmul.f32 0.00048828125, %v227_v2 }
  0xcf   :  { %v185_v4 = vpop.f32.mrf.mxu2  ;;  %341 = vst [vmem:[#allocation8] sm:$0xff] %v325_v3  ;;  %v250_v5 = vpop.f32.mrf.mxu3 }
  0xd0   :  { %v251_v6 = vadd.f32 %v250_v5, %v185_v4 }
  0xd2   :  { %v333_v7 = vmul.f32 0.00048828125, %v251_v6  ;;  %v164_v8 = vpop.f32.mrf.mxu0  ;;  %v229_v9 = vpop.f32.mrf.mxu1 }
  0xd3   :  { %v230_v10 = vadd.f32 %v229_v9, %v164_v8 }
  0xd4   :  { %349 = vst [vmem:[#allocation8 + $0x40] sm:$0xff] %v333_v7 }
  0xd5   :  { %v326_v11 = vmul.f32 0.00048828125, %v230_v10 }
  0xd7   :  { %v188_v12 = vpop.f32.mrf.mxu2  ;;  %342 = vst [vmem:[#allocation8 + $0x8] sm:$0xff] %v326_v11  ;;  %v253_v13 = vpop.f32.mrf.mxu3 }
  0xd8   :  { %v254_v14 = vadd.f32 %v253_v13, %v188_v12 }
  0xda   :  { %v334_v15 = vmul.f32 0.00048828125, %v254_v14  ;;  %v167_v16 = vpop.f32.mrf.mxu0  ;;  %v232_v17 = vpop.f32.mrf.mxu1 }
  0xdb   :  { %v233_v18 = vadd.f32 %v232_v17, %v167_v16 }
  0xdc   :  { %350 = vst [vmem:[#allocation8 + $0x48] sm:$0xff] %v334_v15 }
  0xdd   :  { %v327_v19 = vmul.f32 0.00048828125, %v233_v18 }
  0xdf   :  { %v191_v20 = vpop.f32.mrf.mxu2  ;;  %343 = vst [vmem:[#allocation8 + $0x10] sm:$0xff] %v327_v19  ;;  %v256_v21 = vpop.f32.mrf.mxu3 }
  0xe0   :  { %v257_v22 = vadd.f32 %v256_v21, %v191_v20 }
  0xe2   :  { %v335_v23 = vmul.f32 0.00048828125, %v257_v22  ;;  %v170_v24 = vpop.f32.mrf.mxu0  ;;  %v235_v25 = vpop.f32.mrf.mxu1 }
  0xe3   :  { %v236_v26 = vadd.f32 %v235_v25, %v170_v24 }
  0xe4   :  { %351 = vst [vmem:[#allocation8 + $0x50] sm:$0xff] %v335_v23 }
  0xe5   :  { %v328_v27 = vmul.f32 0.00048828125, %v236_v26 }
  0xe7   :  { %v194_v28 = vpop.f32.mrf.mxu2  ;;  %344 = vst [vmem:[#allocation8 + $0x18] sm:$0xff] %v328_v27  ;;  %v259_v29 = vpop.f32.mrf.mxu3 }
  0xe8   :  { %v260_v30 = vadd.f32 %v259_v29, %v194_v28 }
  0xea   :  { %v336_v31 = vmul.f32 0.00048828125, %v260_v30  ;;  %v173_v32 = vpop.f32.mrf.mxu0  ;;  %v238_v33 = vpop.f32.mrf.mxu1 }
  0xeb   :  { %v239_v34 = vadd.f32 %v238_v33, %v173_v32 }
  0xec   :  { %352 = vst [vmem:[#allocation8 + $0x58] sm:$0xff] %v336_v31 }
  0xed   :  { %v329_v35 = vmul.f32 0.00048828125, %v239_v34 }
  0xef   :  { %v197_v36 = vpop.f32.mrf.mxu2  ;;  %345 = vst [vmem:[#allocation8 + $0x20] sm:$0xff] %v329_v35  ;;  %v262_v37 = vpop.f32.mrf.mxu3 }
  0xf0   :  { %v263_v38 = vadd.f32 %v262_v37, %v197_v36 }
  0xf2   :  { %v337_v39 = vmul.f32 0.00048828125, %v263_v38  ;;  %v176_v40 = vpop.f32.mrf.mxu0  ;;  %v241_v41 = vpop.f32.mrf.mxu1 }
  0xf3   :  { %v242_v42 = vadd.f32 %v241_v41, %v176_v40 }
  0xf4   :  { %353 = vst [vmem:[#allocation8 + $0x60] sm:$0xff] %v337_v39 }
  0xf5   :  { %v330_v43 = vmul.f32 0.00048828125, %v242_v42 }
  0xf7   :  { %v200_v44 = vpop.f32.mrf.mxu2  ;;  %346 = vst [vmem:[#allocation8 + $0x28] sm:$0xff] %v330_v43  ;;  %v265_v45 = vpop.f32.mrf.mxu3 }
  0xf8   :  { %v266_v46 = vadd.f32 %v265_v45, %v200_v44 }
  0xfa   :  { %v338_v47 = vmul.f32 0.00048828125, %v266_v46  ;;  %v179_v48 = vpop.f32.mrf.mxu0  ;;  %v244_v49 = vpop.f32.mrf.mxu1 }
  0xfb   :  { %v245_v50 = vadd.f32 %v244_v49, %v179_v48 }
  0xfc   :  { %354 = vst [vmem:[#allocation8 + $0x68] sm:$0xff] %v338_v47 }
  0xfd   :  { %v331_v51 = vmul.f32 0.00048828125, %v245_v50 }
  0xff   :  { %v203_v52 = vpop.f32.mrf.mxu2  ;;  %347 = vst [vmem:[#allocation8 + $0x30] sm:$0xff] %v331_v51  ;;  %v268_v53 = vpop.f32.mrf.mxu3 }
 0x100   :  { %v269_v54 = vadd.f32 %v268_v53, %v203_v52 }
 0x102   :  { %v339_v55 = vmul.f32 0.00048828125, %v269_v54  ;;  %v182_v56 = vpop.f32.mrf.mxu0  ;;  %v247_v57 = vpop.f32.mrf.mxu1 }
 0x103   :  { %v248_v58 = vadd.f32 %v247_v57, %v182_v56 }
 0x104   :  { %355 = vst [vmem:[#allocation8 + $0x70] sm:$0xff] %v339_v55 }
 0x105   :  { %v332_v59 = vmul.f32 0.00048828125, %v248_v58 }
 0x107   :  { %v206_v60 = vpop.f32.mrf.mxu2  ;;  %348 = vst [vmem:[#allocation8 + $0x38] sm:$0xff] %v332_v59  ;;  %v271_v61 = vpop.f32.mrf.mxu3 }
 0x108   :  { %v272_v62 = vadd.f32 %v271_v61, %v206_v60 }
 0x10a   :  { %v340_v63 = vmul.f32 0.00048828125, %v272_v62 }
 0x10c   :  { %356 = vst [vmem:[#allocation8 + $0x78] sm:$0xff] %v340_v63 }
 0x10d   :  { %369 = dma.vmem_to_hbm [thread:$0]  %s362_s1, 2048, %s364_s23, [#allocation5], %s499_s24, %s499_s24, %s500_s25  }
 0x10e   :  { %492 = dma.done.wait [#allocation5], 2048  }
 0x10f   :  { %493 = vsyncadd [#allocation5], 4294965248 }
 0x110   :  { %374 = vsyncpa [#allocation4], 1 }
 0x111   :  { %375 = vsyncpa [#allocation7], 1 }
 0x112   :  { %376 = vsyncpa [#allocation5], 1 }

</bundles_post_ra>
